<compile_context>
chip_gen: v7x
topology: tpu7x:2x2x1
jax: 0.10.0
libtpu: 0.0.40
codegen_flags: <defaults>
</compile_context>

<pallas_src>
import jax
import jax.numpy as jnp
from jax.experimental import pallas as pl
from jax.experimental.pallas import tpu as pltpu


def _round_up(x, m):
    return ((x + m - 1) // m) * m


def _linear_kernel(x_ref, wt_ref, b_ref, o_ref, acc_ref):
    # Grid = (M tiles, N tiles, K tiles); K (reduction) is last / "arbitrary",
    # so the output block (and acc scratch) stays resident across k.
    @pl.when(pl.program_id(2) == 0)
    def _():
        acc_ref[...] = jnp.zeros_like(acc_ref)

    acc_ref[...] += jnp.dot(x_ref[...], wt_ref[...],
                            preferred_element_type=jnp.float32)

    @pl.when(pl.program_id(2) == pl.num_programs(2) - 1)
    def _():
        o_ref[...] = (acc_ref[...] + b_ref[...]).astype(o_ref.dtype)


def linear_forward(x, w, b, *, tm=256, tn=512, tk=512):
    """z = x @ w.T + b  (PyTorch nn.Linear semantics).

    x: (..., K) f32;  w: (N, K) f32 (PyTorch weight layout);  b: (N,) f32
    returns: (..., N) f32
    """
    lead_shape = x.shape[:-1]
    K = x.shape[-1]
    N = w.shape[0]
    x2 = x.reshape(-1, K)
    M = x2.shape[0]

    # Biggest tile that does not exceed the (alignment-padded) problem size.
    tm = min(tm, _round_up(M, 8))
    tk = min(tk, _round_up(K, 128))
    tn = min(tn, _round_up(N, 128))

    # Pad to tile multiples: satisfies the (8,128) block constraint and keeps
    # the output lane-dense (no masked partial stores). Zero padding is exact
    # for a matmul + bias; padding is sliced off at the end.
    Mp, Kp, Np = _round_up(M, tm), _round_up(K, tk), _round_up(N, tn)
    xp = x2 if (Mp == M and Kp == K) else jnp.pad(x2, ((0, Mp - M), (0, Kp - K)))
    wt = w.T
    wtp = wt if (Kp == K and Np == N) else jnp.pad(wt, ((0, Kp - K), (0, Np - N)))
    b2 = b.reshape(1, -1)
    bp = b2 if Np == N else jnp.pad(b2, ((0, 0), (0, Np - N)))

    grid = (Mp // tm, Np // tn, Kp // tk)

    out = pl.pallas_call(
        _linear_kernel,
        out_shape=jax.ShapeDtypeStruct((Mp, Np), jnp.float32),
        grid_spec=pltpu.PrefetchScalarGridSpec(
            num_scalar_prefetch=0,
            grid=grid,
            in_specs=[
                pl.BlockSpec((tm, tk), lambda i, j, k: (i, k)),   # x tile
                pl.BlockSpec((tk, tn), lambda i, j, k: (k, j)),   # w.T tile
                pl.BlockSpec((1, tn), lambda i, j, k: (0, j)),    # bias tile
            ],
            out_specs=pl.BlockSpec((tm, tn), lambda i, j, k: (i, j)),
            scratch_shapes=[pltpu.VMEM((tm, tn), jnp.float32)],
        ),
        compiler_params=pltpu.CompilerParams(
            dimension_semantics=("parallel", "parallel", "arbitrary")),
    )(xp, wtp, bp)

    return out[:M, :N].reshape(*lead_shape, N)


def init_logistic_regression_params(key, num_features, num_classes):
    """Matches the PyTorch module: xavier_uniform_ weight, default Linear bias."""
    k_w, k_b = jax.random.split(key)
    lim_w = (6.0 / (num_features + num_classes)) ** 0.5
    w = jax.random.uniform(k_w, (num_classes, num_features), jnp.float32,
                           -lim_w, lim_w)
    lim_b = 1.0 / (num_features ** 0.5)
    b = jax.random.uniform(k_b, (num_classes,), jnp.float32, -lim_b, lim_b)
    return w, b


def logistic_regression_forward(x, w, b):
    return linear_forward(x, w, b)


if __name__ == "__main__":
    key = jax.random.PRNGKey(0)
    batch, num_features, num_classes = 64, 32, 10

    k_x, k_p = jax.random.split(key)
    x = jax.random.normal(k_x, (batch, num_features), dtype=jnp.float32)
    w, b = init_logistic_regression_params(k_p, num_features, num_classes)

    z = logistic_regression_forward(x, w, b)
    jax.block_until_ready(z)

    z_ref = x @ w.T + b
    assert z.shape == (batch, num_classes)
    assert jnp.allclose(z, z_ref, atol=1e-5, rtol=1e-5)
    print("KERNEL_OK")
</pallas_src>

<mosaic_0001>
module attributes {stable_mosaic.version = 11 : i64} {
  func.func @_linear_kernel(%arg0: i32, %arg1: i32, %arg2: i32, %arg3: memref<64x128xf32, #tpu.memory_space<vmem>>, %arg4: memref<128x128xf32, #tpu.memory_space<vmem>>, %arg5: memref<1x128xf32, #tpu.memory_space<vmem>>, %arg6: memref<64x128xf32, #tpu.memory_space<vmem>>, %arg7: memref<64x128xf32, #tpu.memory_space<vmem>>) attributes {dimension_semantics = [#tpu.dimension_semantics<parallel>, #tpu.dimension_semantics<parallel>, #tpu.dimension_semantics<arbitrary>], iteration_bounds = array<i64: 1, 1, 1>, scalar_prefetch = 0 : i64, scratch_operands = 1 : i64, tpu.core_type = #tpu.core_type<tc>, window_params = [{transform_indices = @transform_0, window_bounds = array<i64: 64, 128>}, {transform_indices = @transform_1, window_bounds = array<i64: 128, 128>}, {transform_indices = @transform_2, window_bounds = array<i64: 1, 128>}, {transform_indices = @transform_3, window_bounds = array<i64: 64, 128>}]} {
    %c0_i32 = arith.constant 0 : i32
    %0 = arith.cmpi eq, %arg2, %c0_i32 : i32
    %1 = arith.extui %0 : i1 to i32
    %c0_i32_0 = arith.constant 0 : i32
    %2 = arith.cmpi ne, %1, %c0_i32_0 : i32
    scf.if %2 {
      %cst_10 = arith.constant 0.000000e+00 : f32
      %12 = vector.broadcast %cst_10 : f32 to vector<64x128xf32>
      %c0_11 = arith.constant 0 : index
      %c0_12 = arith.constant 0 : index
      %13 = vector.load %arg7[%c0_11, %c0_12] : memref<64x128xf32, #tpu.memory_space<vmem>>, vector<64x128xf32>
      tpu.vector_store %arg7[%c0_11, %c0_12], %12 {strides = array<i32>} : memref<64x128xf32, #tpu.memory_space<vmem>>, vector<64x128xf32>,
    } else {
    }
    %c0 = arith.constant 0 : index
    %c0_1 = arith.constant 0 : index
    %3 = vector.load %arg7[%c0, %c0_1] : memref<64x128xf32, #tpu.memory_space<vmem>>, vector<64x128xf32>
    %c0_2 = arith.constant 0 : index
    %c0_3 = arith.constant 0 : index
    %4 = vector.load %arg3[%c0_2, %c0_3] : memref<64x128xf32, #tpu.memory_space<vmem>>, vector<64x128xf32>
    %c0_4 = arith.constant 0 : index
    %c0_5 = arith.constant 0 : index
    %5 = vector.load %arg4[%c0_4, %c0_5] : memref<128x128xf32, #tpu.memory_space<vmem>>, vector<128x128xf32>
    %cst = arith.constant dense<0.000000e+00> : vector<64x128xf32>
    %6 = tpu.matmul %4, %5, %cst {dimension_numbers = #tpu.dot_dimension_numbers<[1], [0], [0], [1], [0, 0, 1, 1], [], []>} : vector<64x128xf32>, vector<128x128xf32>, vector<64x128xf32> -> vector<64x128xf32>
    %7 = arith.addf %3, %6 : vector<64x128xf32>
    %c0_6 = arith.constant 0 : index
    %c0_7 = arith.constant 0 : index
    %8 = vector.load %arg7[%c0_6, %c0_7] : memref<64x128xf32, #tpu.memory_space<vmem>>, vector<64x128xf32>
    tpu.vector_store %arg7[%c0_6, %c0_7], %7 {strides = array<i32>} : memref<64x128xf32, #tpu.memory_space<vmem>>, vector<64x128xf32>,
    %c0_i32_8 = arith.constant 0 : i32
    %9 = arith.cmpi eq, %arg2, %c0_i32_8 : i32
    %10 = arith.extui %9 : i1 to i32
    %c0_i32_9 = arith.constant 0 : i32
    %11 = arith.cmpi ne, %10, %c0_i32_9 : i32
    scf.if %11 {
      %c0_10 = arith.constant 0 : index
      %c0_11 = arith.constant 0 : index
      %12 = vector.load %arg7[%c0_10, %c0_11] : memref<64x128xf32, #tpu.memory_space<vmem>>, vector<64x128xf32>
      %c0_12 = arith.constant 0 : index
      %c0_13 = arith.constant 0 : index
      %13 = vector.load %arg5[%c0_12, %c0_13] : memref<1x128xf32, #tpu.memory_space<vmem>>, vector<1x128xf32>
      %14 = vector.broadcast %13 : vector<1x128xf32> to vector<64x128xf32>
      %15 = arith.addf %12, %14 : vector<64x128xf32>
      %c0_14 = arith.constant 0 : index
      %c0_15 = arith.constant 0 : index
      %16 = vector.load %arg6[%c0_14, %c0_15] : memref<64x128xf32, #tpu.memory_space<vmem>>, vector<64x128xf32>
      tpu.vector_store %arg6[%c0_14, %c0_15], %15 {strides = array<i32>} : memref<64x128xf32, #tpu.memory_space<vmem>>, vector<64x128xf32>,
    } else {
    }
    return
  }
  func.func @transform_0(%arg0: i32, %arg1: i32, %arg2: i32) -> (i32, i32) {
    %c0_i32 = arith.constant 0 : i32
    return %arg0, %arg2 : i32, i32
  }
  func.func @transform_1(%arg0: i32, %arg1: i32, %arg2: i32) -> (i32, i32) {
    %c0_i32 = arith.constant 0 : i32
    return %arg2, %arg1 : i32, i32
  }
  func.func @transform_2(%arg0: i32, %arg1: i32, %arg2: i32) -> (i32, i32) {
    %c0_i32 = arith.constant 0 : i32
    %c0_i32_0 = arith.constant 0 : i32
    return %c0_i32, %arg1 : i32, i32
  }
  func.func @transform_3(%arg0: i32, %arg1: i32, %arg2: i32) -> (i32, i32) {
    %c0_i32 = arith.constant 0 : i32
    return %arg0, %arg1 : i32, i32
  }
}

</mosaic_0001>

<bundles_post_ra>
// kernel: tpu_custom_call.1
= control target key start
LH: loop header
LB: loop body
LE: loop exit
PB: predicated region body
PF: predicated region fallthrough
CT: control target
= control target key end

     0   :  { %8 = vsyncpa [#allocation4], 0  ;;  %s527_s0 = inlined_call_operand.hbm [shape: f32[64,128], index: 0, kind: input, shape index: {}]   ;;  %s528_s1 = inlined_call_operand.hbm [shape: f32[128,128], index: 1, kind: input, shape index: {}]   ;;  %s529_s2 = inlined_call_operand.vmem [shape: f32[1,128], index: 2, kind: input, shape index: {}]   ;;  %s530_s3 = inlined_call_operand.hbm [shape: f32[64,128], index: 3, kind: output, shape index: {}]  }
   0x1   :  { %9 = vsyncpa [#allocation7], 0 }
   0x2   :  { %10 = vsyncpa [#allocation5], 0  ;;  %s454_s12 = smov [#allocation3]   ;;  %s382_s16 = scalar_lea.hbm %s527_s0, 1024 }
   0x3   :  { %s16_s13 = sshll.u32 %s454_s12, 4  ;;  %p383_p0 = scmp.ne.s32.totalorder %s527_s0, %s382_s16  ;;  %s17_s13 = int_to_ptr.vmem [resolvable:$true] %s16_s13 }
   0x4   :  { %p386_p1 = scmp.lt.u32.totalorder %s382_s16, %s527_s0 }
   0x6   :  { %p388_p2 = pnand %p386_p1, %p383_p0 }
   0x8   :  { %391 = shalt.err (!%p388_p2)
}
   0x9   :  { %s392_s21 = scalar_lea.vmem %s17_s13, 1024  ;;  %p397_p4 = scmp.lt.s32.totalorder %s17_s13, %s17_s13 }
   0xa   :  { %p393_p3 = scmp.ne.s32.totalorder %s17_s13, %s392_s21  ;;  %p398_p5 = scmp.lt.s32.totalorder %s392_s21, %s392_s21 }
   0xc   :  { %p399_p6 = por %p398_p5, %p397_p4 }
   0xe   :  { %p400_p7 = pnand %p399_p6, %p393_p3 }
  0x10   :  { %403 = shalt.err (!%p400_p7)
}
  0x11   :  { %s455_s22 = smov 128   ;;  %s456_s23 = smov 8  }
  0x12   :  { %22 = dma.hbm_to_vmem [thread:$0]  %s527_s0, 1024, %s17_s13, [#allocation4], %s455_s22, %s455_s22, %s456_s23  }
  0x13   :  { %s457_s26 = smov [#allocation6]   ;;  %s404_s30 = scalar_lea.hbm %s528_s1, 2048 }
  0x14   :  { %s28_s27 = sshll.u32 %s457_s26, 4  ;;  %p405_p8 = scmp.ne.s32.totalorder %s528_s1, %s404_s30  ;;  %s29_s27 = int_to_ptr.vmem [resolvable:$true] %s28_s27 }
  0x15   :  { %p408_p9 = scmp.lt.u32.totalorder %s404_s30, %s528_s1 }
  0x17   :  { %p410_p10 = pnand %p408_p9, %p405_p8 }
  0x19   :  { %413 = shalt.err (!%p410_p10)
}
  0x1a   :  { %s414_s8 = scalar_lea.vmem %s29_s27, 2048  ;;  %p419_p12 = scmp.lt.s32.totalorder %s29_s27, %s29_s27 }
  0x1b   :  { %p415_p11 = scmp.ne.s32.totalorder %s29_s27, %s414_s8  ;;  %p420_p13 = scmp.lt.s32.totalorder %s414_s8, %s414_s8 }
  0x1d   :  { %p421_p0 = por %p420_p13, %p419_p12 }
  0x1f   :  { %p422_p1 = pnand %p421_p0, %p415_p11 }
  0x21   :  { %425 = shalt.err (!%p422_p1)
}
  0x22   :  { %34 = dma.hbm_to_vmem [thread:$0]  %s528_s1, 2048, %s29_s27, [#allocation7], %s455_s22, %s455_s22, %s456_s23  }
  0x23   :  { %448 = dma.done.wait [#allocation4], 1024  }
  0x24   :  { %449 = vsyncadd [#allocation4], 4294966272 }
  0x25   :  { %450 = dma.done.wait [#allocation7], 2048  }
  0x26   :  { %451 = vsyncadd [#allocation7], 4294965248  ;;  %v71_v0 = vld [vmem:[#allocation6] sm:$0xff]  ;;  %v72_v1 = vld [vmem:[#allocation6 + $0x8] sm:$0xff]  ;;  %s458_s11 = smov [#allocation8]  }
  0x27   :  { %v73_v2 = vld [vmem:[#allocation6 + $0x10] sm:$0xff]  ;;  %v329_v3 = vpack.c.bf16 %v72_v1, %v71_v0  ;;  %v74_v4 = vld [vmem:[#allocation6 + $0x18] sm:$0xff]  ;;  %v75_v6 = vld [vmem:[#allocation6 + $0x20] sm:$0xff]  ;;  %s247_s12 = sshll.u32 %s458_s11, 4  ;;  %s248_s12 = int_to_ptr.vmem [resolvable:$true] %s247_s12 }
  0x28   :  { %v333_v5 = vpack.c.bf16 %v74_v4, %v73_v2  ;;  %v76_v7 = vld [vmem:[#allocation6 + $0x28] sm:$0xff]  ;;  %v63_v9 = vld [vmem:[#allocation3] sm:$0xff]  ;;  %v77_v11 = vld [vmem:[#allocation6 + $0x30] sm:$0xff]  ;;  %p431_p3 = scmp.lt.s32.totalorder %s248_s12, %s248_s12 }
  0x29   :  { %330 = vmatprep.subr.bf16.mxu0 %v329_v3  ;;  %361 = vmatprep.subr.bf16.mxu1 %v329_v3  ;;  %v337_v8 = vpack.c.bf16 %v76_v7, %v75_v6  ;;  %v67_v10 = vld [vmem:[#allocation3 + $0x20] sm:$0xff]  ;;  %v78_v12 = vld [vmem:[#allocation6 + $0x38] sm:$0xff]  ;;  %v80_v15 = vld [vmem:[#allocation6 + $0x48] sm:$0xff] }
  0x2a   :  { %332 = vmatpush3.bf16.msra.mxu0 %v329_v3  ;;  %369 = vmatpush3.bf16.msra.mxu1 %v329_v3  ;;  %v341_v13 = vpack.c.bf16 %v78_v12, %v77_v11  ;;  %v79_v14 = vld [vmem:[#allocation6 + $0x40] sm:$0xff]  ;;  %v81_v17 = vld [vmem:[#allocation6 + $0x50] sm:$0xff]  ;;  %v82_v18 = vld [vmem:[#allocation6 + $0x58] sm:$0xff] }
  0x2b   :  { %334 = vmatprep.subr.bf16.mxu0 %v333_v5  ;;  %362 = vmatprep.subr.bf16.mxu1 %v333_v5  ;;  %v345_v16 = vpack.c.bf16 %v80_v15, %v79_v14  ;;  %v349_v19 = vpack.c.bf16 %v82_v18, %v81_v17  ;;  %v83_v20 = vld [vmem:[#allocation6 + $0x60] sm:$0xff]  ;;  %v84_v21 = vld [vmem:[#allocation6 + $0x68] sm:$0xff]  ;;  %v85_v23 = vld [vmem:[#allocation6 + $0x70] sm:$0xff] }
  0x2c   :  { %317 = vmatprep.mubr.f32.mxu0 %v63_v9  ;;  %323 = vmatprep.mubr.f32.mxu1 %v67_v10  ;;  %v353_v22 = vpack.c.bf16 %v84_v21, %v83_v20  ;;  %v86_v24 = vld [vmem:[#allocation6 + $0x78] sm:$0xff]  ;;  %v64_v26 = vld [vmem:[#allocation3 + $0x8] sm:$0xff]  ;;  %v65_v28 = vld [vmem:[#allocation3 + $0x10] sm:$0xff] }
  0x2d   :  { %v357_v25 = vpack.c.bf16 %v86_v24, %v85_v23  ;;  %v68_v27 = vld [vmem:[#allocation3 + $0x28] sm:$0xff]  ;;  %v69_v29 = vld [vmem:[#allocation3 + $0x30] sm:$0xff]  ;;  %v66_v30 = vld [vmem:[#allocation3 + $0x18] sm:$0xff] }
  0x2e   :  { %336 = vmatpush3.bf16.msra.mxu0 %v333_v5  ;;  %370 = vmatpush3.bf16.msra.mxu1 %v333_v5  ;;  %v70_v31 = vld [vmem:[#allocation3 + $0x38] sm:$0xff]  ;;  %v260_v32 = vld [vmem:[%s529_s2] ss:$0 sm:$0xff]  ;;  %s426_s2 = scalar_lea.vmem %s248_s12, 1024 }
  0x2f   :  { %338 = vmatprep.subr.bf16.mxu0 %v337_v8  ;;  %363 = vmatprep.subr.bf16.mxu1 %v337_v8  ;;  %p427_p2 = scmp.ne.s32.totalorder %s248_s12, %s426_s2  ;;  %p432_p4 = scmp.lt.s32.totalorder %s426_s2, %s426_s2 }
  0x31   :  { %p433_p5 = por %p432_p4, %p431_p3 }
  0x32   :  { %340 = vmatpush3.bf16.msra.mxu0 %v337_v8  ;;  %371 = vmatpush3.bf16.msra.mxu1 %v337_v8 }
  0x33   :  { %342 = vmatprep.subr.bf16.mxu0 %v341_v13  ;;  %364 = vmatprep.subr.bf16.mxu1 %v341_v13  ;;  %p434_p6 = pnand %p433_p5, %p427_p2 }
  0x36   :  { %344 = vmatpush3.bf16.msra.mxu0 %v341_v13  ;;  %372 = vmatpush3.bf16.msra.mxu1 %v341_v13 }
  0x37   :  { %346 = vmatprep.subr.bf16.mxu0 %v345_v16  ;;  %365 = vmatprep.subr.bf16.mxu1 %v345_v16 }
  0x3a   :  { %348 = vmatpush3.bf16.msra.mxu0 %v345_v16  ;;  %373 = vmatpush3.bf16.msra.mxu1 %v345_v16 }
  0x3b   :  { %350 = vmatprep.subr.bf16.mxu0 %v349_v19  ;;  %366 = vmatprep.subr.bf16.mxu1 %v349_v19 }
  0x3e   :  { %352 = vmatpush3.bf16.msra.mxu0 %v349_v19  ;;  %374 = vmatpush3.bf16.msra.mxu1 %v349_v19 }
  0x3f   :  { %354 = vmatprep.subr.bf16.mxu0 %v353_v22  ;;  %367 = vmatprep.subr.bf16.mxu1 %v353_v22 }
  0x42   :  { %356 = vmatpush3.bf16.msra.mxu0 %v353_v22  ;;  %375 = vmatpush3.bf16.msra.mxu1 %v353_v22 }
  0x43   :  { %358 = vmatprep.subr.bf16.mxu0 %v357_v25  ;;  %368 = vmatprep.subr.bf16.mxu1 %v357_v25 }
  0x46   :  { %360 = vmatpush3.bf16.msra.mxu0 %v357_v25  ;;  %376 = vmatpush3.bf16.msra.mxu1 %v357_v25 }
  0x49   :  { %318 = vmatmul.mubr.f32.vlgmr.msra.gmra.mrb[0].mxu0 %v64_v26  ;;  %324 = vmatmul.mubr.f32.vlgmr.msra.gmra.mrb[0].mxu1 %v68_v27 }
  0x4a   :  { %320 = vmatprep.mubr.f32.mxu0 %v65_v28  ;;  %326 = vmatprep.mubr.f32.mxu1 %v69_v29 }
  0x4d   :  { %321 = vmatmul.mubr.f32.gmra.mrb[2].mxu0 %v66_v30  ;;  %327 = vmatmul.mubr.f32.gmra.mrb[2].mxu1 %v70_v31 }
 0x11c   :  { %v319_v33 = vpop.f32.mrb[0].mxu0  ;;  %v325_v34 = vpop.f32.mrb[0].mxu1 }
 0x11d   :  { %v227_v35 = vadd.f32 %v319_v33, %v260_v32  ;;  %v231_v36 = vadd.f32 %v325_v34, %v260_v32  ;;  %v153_v37 = vpop.f32.mrb[1].mxu0  ;;  %v173_v38 = vpop.f32.mrb[1].mxu1 }
 0x11e   :  { %v226_v39 = vadd.f32 %v260_v32, %v153_v37  ;;  %v230_v40 = vadd.f32 %v260_v32, %v173_v38 }
 0x11f   :  { %235 = vst [vmem:[#allocation8 + $0x8] sm:$0xff] %v227_v35  ;;  %239 = vst [vmem:[#allocation8 + $0x28] sm:$0xff] %v231_v36 }
 0x120   :  { %234 = vst [vmem:[#allocation8] sm:$0xff] %v226_v39  ;;  %238 = vst [vmem:[#allocation8 + $0x20] sm:$0xff] %v230_v40  ;;  %v322_v41 = vpop.f32.mrb[2].mxu0  ;;  %v328_v42 = vpop.f32.mrb[2].mxu1 }
 0x121   :  { %v229_v43 = vadd.f32 %v322_v41, %v260_v32  ;;  %v233_v44 = vadd.f32 %v328_v42, %v260_v32  ;;  %v163_v45 = vpop.f32.mrb[3].mxu0  ;;  %v183_v46 = vpop.f32.mrb[3].mxu1 }
 0x122   :  { %v228_v47 = vadd.f32 %v260_v32, %v163_v45  ;;  %v232_v48 = vadd.f32 %v260_v32, %v183_v46 }
 0x123   :  { %237 = vst [vmem:[#allocation8 + $0x18] sm:$0xff] %v229_v43  ;;  %241 = vst [vmem:[#allocation8 + $0x38] sm:$0xff] %v233_v44 }
 0x124   :  { %236 = vst [vmem:[#allocation8 + $0x10] sm:$0xff] %v228_v47  ;;  %240 = vst [vmem:[#allocation8 + $0x30] sm:$0xff] %v232_v48 }
 0x125   :  { %437 = shalt.err (!%p434_p6)
}
 0x126   :  { %s438_s15 = scalar_lea.hbm %s530_s3, 1024 }
 0x127   :  { %p439_p7 = scmp.ne.s32.totalorder %s530_s3, %s438_s15  ;;  %p442_p8 = scmp.lt.u32.totalorder %s438_s15, %s530_s3 }
 0x129   :  { %p444_p9 = pnand %p442_p8, %p439_p7 }
 0x12b   :  { %447 = shalt.err (!%p444_p9)
}
 0x12c   :  { %253 = dma.vmem_to_hbm [thread:$0]  %s248_s12, 1024, %s530_s3, [#allocation5], %s455_s22, %s455_s22, %s456_s23  }
 0x12d   :  { %452 = dma.done.wait [#allocation5], 1024  }
 0x12e   :  { %453 = vsyncadd [#allocation5], 4294966272 }
 0x12f   :  { %257 = vsyncpa [#allocation4], 1 }
 0x130   :  { %258 = vsyncpa [#allocation7], 1 }
 0x131   :  { %259 = vsyncpa [#allocation5], 1 }

</bundles_post_ra>
